<compile_context>
chip_gen: v7x
topology: tpu7x:2x2x1
jax: 0.10.0
libtpu: 0.0.40
codegen_flags: <defaults>
</compile_context>

<pallas_src>
import functools

import jax
import jax.numpy as jnp
from jax.experimental import pallas as pl
from jax.experimental.pallas import tpu as pltpu


def _round_up(v, m):
    return ((v + m - 1) // m) * m


def _res_block_kernel(x_ref, mask_ref, w1_ref, b1_ref, w2_ref, b2_ref, out_ref,
                      *, slope, pooling, W, L, Cin, Cout, per_tap, mxu_dtype):
    x = x_ref[0]                    # (Cin, L), f32, lane-dense
    masks = mask_ref[...]           # (9, L), f32 per-image boundary masks

    def leaky(v):
        return jnp.where(v >= 0, v, slope * v)

    offs = [dh * W + dw for dh in (-1, 0, 1) for dw in (-1, 0, 1)]

    def taps_of(v):
        """9 shifted/masked taps of v:(C, L), cast to the MXU operand dtype."""
        taps = []
        for t, off in enumerate(offs):
            if off == 0:
                tap = v
            else:
                tap = pltpu.roll(v, (-off) % L, axis=1) * masks[t:t + 1]
            taps.append(tap.astype(mxu_dtype))
        return taps

    def conv3x3(v, w_mat, b_col, c_in):
        """w_mat: (M, 9*c_in) mxu_dtype, b_col: (M, 1) f32 -> (M, L) f32."""
        taps = taps_of(v)
        if per_tap:
            acc = None
            for t in range(9):
                wt = w_mat[:, t * c_in:(t + 1) * c_in]
                d = jnp.dot(wt, taps[t], preferred_element_type=jnp.float32)
                acc = d if acc is None else acc + d
            return acc + b_col
        p = jnp.concatenate(taps, axis=0)             # (9*c_in, L)
        return jnp.dot(w_mat, p, preferred_element_type=jnp.float32) + b_col

    # ---- conv1 (3x3) + fused 1x1 residual conv (extra output rows) ----
    z = conv3x3(x, w1_ref[...], b1_ref[...], Cin)     # (2*Cout, L)
    h1 = leaky(z[:Cout, :])
    res = z[Cout:2 * Cout, :]                         # residual branch (bias included)

    # ---- conv2 (3x3) ----
    h2 = leaky(conv3x3(h1, w2_ref[...], b2_ref[...], Cout))
    out2 = h2 + res                                   # (Cout, L) f32

    if pooling:
        # 2x2/stride-2 max-pool: 4-way rolled max; the top-left lane of each 2x2
        # window holds the window max.  Store full-res lane-dense map; the ::2
        # compaction happens in the XLA wrapper (no O(HW^2) selection matmul).
        m = jnp.maximum(out2, pltpu.roll(out2, L - 1, axis=1))   # +1 (w)
        m = jnp.maximum(m, pltpu.roll(m, L - W, axis=1))         # +W (h)
        out_ref[0] = m.astype(out_ref.dtype)
    else:
        out_ref[0] = out2.astype(out_ref.dtype)


def res_block_forward(x_nchw, params, *, slope=0.1, pooling=True,
                      batch_block=None, mxu_dtype=None, per_tap=None):
    w1, b1 = params["w1"], params["b1"]
    w2, b2 = params["w2"], params["b2"]
    wr, br = params["wr"], params["br"]

    N, Cin, H, W = x_nchw.shape
    Cout = w1.shape[-1]
    HW = H * W
    f32 = jnp.float32

    # Channel padding to sublane multiples (8); zero weights keep results exact.
    Cin_p = _round_up(Cin, 8)
    Cout_p = _round_up(Cout, 8)

    # ---- batch folding: B_blk images share one grid step (lane axis = B_blk*HW).
    # Keep grid >= 2 when possible (v7x megacore), and cap the im2col slab size.
    if batch_block is None:
        slab_budget = 2 * 1024 * 1024
        batch_block = 1
        for d in range(N, 0, -1):
            if N % d:
                continue
            if N // d < min(2, N):
                continue
            if 9 * max(Cin_p, Cout_p) * (d * HW) * 4 > slab_budget:
                continue
            batch_block = d
            break
    assert N % batch_block == 0
    B_blk = batch_block
    G = N // B_blk
    L = B_blk * HW

    if mxu_dtype is None:   # bf16 MXU operands only pay once the kernel is MXU-bound
        mxu_dtype = jnp.bfloat16 if max(Cin_p, Cout_p) >= 64 else jnp.float32
    if per_tap is None:     # avoid the 9x concat slab at production channel counts
        per_tap = max(Cin_p, Cout_p) >= 128

    # ---- fold batch into the lane axis: (G, Cin_p, B_blk*HW) ----
    x = x_nchw.astype(f32).reshape(G, B_blk, Cin, HW)
    x = jnp.transpose(x, (0, 2, 1, 3)).reshape(G, Cin, L)
    if Cin_p != Cin:
        x = jnp.pad(x, ((0, 0), (0, Cin_p - Cin), (0, 0)))

    def pad_hwio(w, ci, ci_p, co, co_p):
        return jnp.pad(w.astype(f32),
                       ((0, 0), (0, 0), (0, ci_p - ci), (0, co_p - co)))

    w1p = pad_hwio(w1, Cin, Cin_p, Cout, Cout_p)          # (3,3,Cin_p,Cout_p)
    w2p = pad_hwio(w2, Cout, Cout_p, Cout, Cout_p)        # (3,3,Cout_p,Cout_p)
    wrp = jnp.pad(wr.astype(f32), ((0, Cin_p - Cin), (0, Cout_p - Cout)))
    b1p = jnp.pad(b1.astype(f32), (0, Cout_p - Cout))
    b2p = jnp.pad(b2.astype(f32), (0, Cout_p - Cout))
    brp = jnp.pad(br.astype(f32), (0, Cout_p - Cout))

    # Weight matrices; patch-row order is (kh, kw, ci).  1x1 residual is fused
    # into conv1's matmul as extra output rows (center tap only).
    w1m = jnp.transpose(w1p, (3, 0, 1, 2)).reshape(Cout_p, 9 * Cin_p)
    wr_blk = jnp.zeros((Cout_p, 9 * Cin_p), f32)
    wr_blk = wr_blk.at[:, 4 * Cin_p:5 * Cin_p].set(wrp.T)
    w1e = jnp.concatenate([w1m, wr_blk], axis=0).astype(mxu_dtype)   # (2*Cout_p, 9*Cin_p)
    b1e = jnp.concatenate([b1p, brp]).reshape(2 * Cout_p, 1)         # f32
    w2m = jnp.transpose(w2p, (3, 0, 1, 2)).reshape(Cout_p, 9 * Cout_p).astype(mxu_dtype)
    b2c = b2p.reshape(Cout_p, 1)                                     # f32

    # Per-tap zero-padding masks over one image's flat spatial axis, tiled per
    # folded image.  They also zero every cross-image tap after folding.
    hh, ww = jnp.meshgrid(jnp.arange(H), jnp.arange(W), indexing="ij")
    mask_rows = []
    for dh in (-1, 0, 1):
        for dw in (-1, 0, 1):
            m = ((hh + dh >= 0) & (hh + dh < H) &
                 (ww + dw >= 0) & (ww + dw < W))
            mask_rows.append(m.reshape(HW))
    masks = jnp.tile(jnp.stack(mask_rows).astype(f32), (1, B_blk))   # (9, L)

    kernel = functools.partial(_res_block_kernel, slope=slope, pooling=pooling,
                               W=W, L=L, Cin=Cin_p, Cout=Cout_p,
                               per_tap=per_tap, mxu_dtype=mxu_dtype)

    out = pl.pallas_call(
        kernel,
        out_shape=jax.ShapeDtypeStruct((G, Cout_p, L), x_nchw.dtype),
        grid_spec=pltpu.PrefetchScalarGridSpec(
            num_scalar_prefetch=0,
            grid=(G,),
            in_specs=[
                pl.BlockSpec((1, Cin_p, L), lambda g: (g, 0, 0)),
                pl.BlockSpec((9, L), lambda g: (0, 0)),
                pl.BlockSpec((2 * Cout_p, 9 * Cin_p), lambda g: (0, 0)),
                pl.BlockSpec((2 * Cout_p, 1), lambda g: (0, 0)),
                pl.BlockSpec((Cout_p, 9 * Cout_p), lambda g: (0, 0)),
                pl.BlockSpec((Cout_p, 1), lambda g: (0, 0)),
            ],
            out_specs=pl.BlockSpec((1, Cout_p, L), lambda g: (g, 0, 0)),
        ),
        compiler_params=pltpu.CompilerParams(
            dimension_semantics=("parallel",),
            vmem_limit_bytes=32 * 1024 * 1024),
    )(x, masks, w1e, b1e, w2m, b2c)

    # Un-fold batch, drop channel padding; ::2 slice implements the pool compaction.
    out = out.reshape(G, Cout_p, B_blk, H, W)
    out = jnp.transpose(out, (0, 2, 1, 3, 4)).reshape(N, Cout_p, H, W)
    out = out[:, :Cout]
    if pooling:
        out = out[:, :, : 2 * (H // 2): 2, : 2 * (W // 2): 2]
    return out


def res_block_ref(x_nchw, params, *, slope=0.1, pooling=True):
    """Pure-JAX reference (mirrors the PyTorch forward)."""
    w1, b1 = params["w1"], params["b1"]
    w2, b2 = params["w2"], params["b2"]
    wr, br = params["wr"], params["br"]

    def conv(x, w):  # x: NCHW, w: HWIO
        dn = jax.lax.conv_dimension_numbers(x.shape, w.shape,
                                            ('NCHW', 'HWIO', 'NCHW'))
        return jax.lax.conv_general_dilated(x, w, (1, 1), 'SAME',
                                            dimension_numbers=dn)

    def leaky(v):
        return jnp.where(v >= 0, v, slope * v)

    out = leaky(conv(x_nchw, w1) + b1.reshape(1, -1, 1, 1))
    out = leaky(conv(out, w2) + b2.reshape(1, -1, 1, 1))
    res = conv(x_nchw, wr.reshape(1, 1, *wr.shape)) + br.reshape(1, -1, 1, 1)
    out = out + res
    if pooling:
        out = jax.lax.reduce_window(out, -jnp.inf, jax.lax.max,
                                    (1, 1, 2, 2), (1, 1, 2, 2), 'VALID')
    return out


if __name__ == "__main__":
    Cin, Cout, H, W = 4, 8, 16, 16
    key = jax.random.PRNGKey(0)
    ks = jax.random.split(key, 8)
    params = {
        "w1": 0.1 * jax.random.normal(ks[0], (3, 3, Cin, Cout), jnp.float32),
        "b1": 0.1 * jax.random.normal(ks[1], (Cout,), jnp.float32),
        "w2": 0.1 * jax.random.normal(ks[2], (3, 3, Cout, Cout), jnp.float32),
        "b2": 0.1 * jax.random.normal(ks[3], (Cout,), jnp.float32),
        "wr": 0.1 * jax.random.normal(ks[4], (Cin, Cout), jnp.float32),
        "br": 0.1 * jax.random.normal(ks[5], (Cout,), jnp.float32),
    }
    x2 = jax.random.normal(ks[6], (2, Cin, H, W), jnp.float32)
    x4 = jax.random.normal(ks[7], (4, Cin, H, W), jnp.float32)

    def check(name, out, ref, atol, rtol):
        out = jax.block_until_ready(out)
        if out.shape != ref.shape:
            raise AssertionError(f"{name}: shape {out.shape} != {ref.shape}")
        if not jnp.allclose(out, ref, atol=atol, rtol=rtol):
            raise AssertionError(
                f"{name}: max abs diff {float(jnp.max(jnp.abs(out - ref)))}")

    # 1) pooling=True, f32 MXU, grid=2 (B_blk=1)
    check("pool_f32",
          res_block_forward(x2, params, slope=0.1, pooling=True),
          res_block_ref(x2, params, slope=0.1, pooling=True), 1e-4, 1e-4)

    # 2) pooling=False path
    check("nopool_f32",
          res_block_forward(x2, params, slope=0.1, pooling=False),
          res_block_ref(x2, params, slope=0.1, pooling=False), 1e-4, 1e-4)

    # 3) batch folding: N=4 -> B_blk=2 images per grid step, grid stays 2
    check("pool_f32_batchfold",
          res_block_forward(x4, params, slope=0.1, pooling=True),
          res_block_ref(x4, params, slope=0.1, pooling=True), 1e-4, 1e-4)

    # 4) bf16 MXU operands + per-tap accumulate path (looser tolerance)
    check("pool_bf16_pertap",
          res_block_forward(x2, params, slope=0.1, pooling=True,
                            mxu_dtype=jnp.bfloat16, per_tap=True),
          res_block_ref(x2, params, slope=0.1, pooling=True), 5e-2, 5e-2)

    print("KERNEL_OK")
</pallas_src>

<mosaic_0001>
module attributes {stable_mosaic.version = 11 : i64} {
  func.func @_res_block_kernel(%arg0: i32, %arg1: memref<1x8x256xf32, #tpu.memory_space<vmem>>, %arg2: memref<9x256xf32, #tpu.memory_space<vmem>>, %arg3: memref<16x72xf32, #tpu.memory_space<vmem>>, %arg4: memref<16x1xf32, #tpu.memory_space<vmem>>, %arg5: memref<8x72xf32, #tpu.memory_space<vmem>>, %arg6: memref<8x1xf32, #tpu.memory_space<vmem>>, %arg7: memref<1x8x256xf32, #tpu.memory_space<vmem>>) attributes {dimension_semantics = [#tpu.dimension_semantics<parallel>], iteration_bounds = array<i64: 2>, scalar_prefetch = 0 : i64, scratch_operands = 0 : i64, tpu.core_type = #tpu.core_type<tc>, window_params = [{transform_indices = @transform_0, window_bounds = array<i64: 1, 8, 256>}, {pipeline_mode = #tpu.pipeline_mode<synchronous>, transform_indices = @transform_1, window_bounds = array<i64: 9, 256>}, {pipeline_mode = #tpu.pipeline_mode<synchronous>, transform_indices = @transform_2, window_bounds = array<i64: 16, 72>}, {pipeline_mode = #tpu.pipeline_mode<synchronous>, transform_indices = @transform_3, window_bounds = array<i64: 16, 1>}, {pipeline_mode = #tpu.pipeline_mode<synchronous>, transform_indices = @transform_4, window_bounds = array<i64: 8, 72>}, {pipeline_mode = #tpu.pipeline_mode<synchronous>, transform_indices = @transform_5, window_bounds = array<i64: 8, 1>}, {transform_indices = @transform_6, window_bounds = array<i64: 1, 8, 256>}]} {
    %c0 = arith.constant 0 : index
    %c0_0 = arith.constant 0 : index
    %c0_1 = arith.constant 0 : index
    %0 = vector.load %arg1[%c0, %c0_0, %c0_1] : memref<1x8x256xf32, #tpu.memory_space<vmem>>, vector<1x8x256xf32>
    %1 = vector.shape_cast %0 : vector<1x8x256xf32> to vector<8x256xf32>
    %c0_2 = arith.constant 0 : index
    %c0_3 = arith.constant 0 : index
    %2 = vector.load %arg2[%c0_2, %c0_3] : memref<9x256xf32, #tpu.memory_space<vmem>>, vector<9x256xf32>
    %c0_4 = arith.constant 0 : index
    %c0_5 = arith.constant 0 : index
    %3 = vector.load %arg3[%c0_4, %c0_5] : memref<16x72xf32, #tpu.memory_space<vmem>>, vector<16x72xf32>
    %c0_6 = arith.constant 0 : index
    %c0_7 = arith.constant 0 : index
    %4 = vector.load %arg4[%c0_6, %c0_7] : memref<16x1xf32, #tpu.memory_space<vmem>>, vector<16x1xf32>
    %c17_i32 = arith.constant 17 : i32
    %5 = tpu.dynamic_rotate %1 by %c17_i32 dim 1 : vector<8x256xf32>, i32 -> vector<8x256xf32>
    %6 = vector.extract_strided_slice %2 {offsets = [0, 0], sizes = [1, 256], strides = [1, 1]} : vector<9x256xf32> to vector<1x256xf32>
    %7 = vector.broadcast %6 : vector<1x256xf32> to vector<8x256xf32>
    %8 = arith.mulf %5, %7 : vector<8x256xf32>
    %c16_i32 = arith.constant 16 : i32
    %9 = tpu.dynamic_rotate %1 by %c16_i32 dim 1 : vector<8x256xf32>, i32 -> vector<8x256xf32>
    %10 = vector.extract_strided_slice %2 {offsets = [1, 0], sizes = [1, 256], strides = [1, 1]} : vector<9x256xf32> to vector<1x256xf32>
    %11 = vector.broadcast %10 : vector<1x256xf32> to vector<8x256xf32>
    %12 = arith.mulf %9, %11 : vector<8x256xf32>
    %c15_i32 = arith.constant 15 : i32
    %13 = tpu.dynamic_rotate %1 by %c15_i32 dim 1 : vector<8x256xf32>, i32 -> vector<8x256xf32>
    %14 = vector.extract_strided_slice %2 {offsets = [2, 0], sizes = [1, 256], strides = [1, 1]} : vector<9x256xf32> to vector<1x256xf32>
    %15 = vector.broadcast %14 : vector<1x256xf32> to vector<8x256xf32>
    %16 = arith.mulf %13, %15 : vector<8x256xf32>
    %c1_i32 = arith.constant 1 : i32
    %17 = tpu.dynamic_rotate %1 by %c1_i32 dim 1 : vector<8x256xf32>, i32 -> vector<8x256xf32>
    %18 = vector.extract_strided_slice %2 {offsets = [3, 0], sizes = [1, 256], strides = [1, 1]} : vector<9x256xf32> to vector<1x256xf32>
    %19 = vector.broadcast %18 : vector<1x256xf32> to vector<8x256xf32>
    %20 = arith.mulf %17, %19 : vector<8x256xf32>
    %c255_i32 = arith.constant 255 : i32
    %21 = tpu.dynamic_rotate %1 by %c255_i32 dim 1 : vector<8x256xf32>, i32 -> vector<8x256xf32>
    %22 = vector.extract_strided_slice %2 {offsets = [5, 0], sizes = [1, 256], strides = [1, 1]} : vector<9x256xf32> to vector<1x256xf32>
    %23 = vector.broadcast %22 : vector<1x256xf32> to vector<8x256xf32>
    %24 = arith.mulf %21, %23 : vector<8x256xf32>
    %c241_i32 = arith.constant 241 : i32
    %25 = tpu.dynamic_rotate %1 by %c241_i32 dim 1 : vector<8x256xf32>, i32 -> vector<8x256xf32>
    %26 = vector.extract_strided_slice %2 {offsets = [6, 0], sizes = [1, 256], strides = [1, 1]} : vector<9x256xf32> to vector<1x256xf32>
    %27 = vector.broadcast %26 : vector<1x256xf32> to vector<8x256xf32>
    %28 = arith.mulf %25, %27 : vector<8x256xf32>
    %c240_i32 = arith.constant 240 : i32
    %29 = tpu.dynamic_rotate %1 by %c240_i32 dim 1 : vector<8x256xf32>, i32 -> vector<8x256xf32>
    %30 = vector.extract_strided_slice %2 {offsets = [7, 0], sizes = [1, 256], strides = [1, 1]} : vector<9x256xf32> to vector<1x256xf32>
    %31 = vector.broadcast %30 : vector<1x256xf32> to vector<8x256xf32>
    %32 = arith.mulf %29, %31 : vector<8x256xf32>
    %c239_i32 = arith.constant 239 : i32
    %33 = tpu.dynamic_rotate %1 by %c239_i32 dim 1 : vector<8x256xf32>, i32 -> vector<8x256xf32>
    %34 = vector.extract_strided_slice %2 {offsets = [8, 0], sizes = [1, 256], strides = [1, 1]} : vector<9x256xf32> to vector<1x256xf32>
    %35 = vector.broadcast %34 : vector<1x256xf32> to vector<8x256xf32>
    %36 = arith.mulf %33, %35 : vector<8x256xf32>
    %37 = tpu.concatenate %8, %12, %16, %20, %1, %24, %28, %32, %36 in 0 : vector<8x256xf32>, vector<8x256xf32>, vector<8x256xf32>, vector<8x256xf32>, vector<8x256xf32>, vector<8x256xf32>, vector<8x256xf32>, vector<8x256xf32>, vector<8x256xf32> -> vector<72x256xf32>
    %cst = arith.constant dense<0.000000e+00> : vector<16x256xf32>
    %38 = tpu.matmul %3, %37, %cst {dimension_numbers = #tpu.dot_dimension_numbers<[1], [0], [0], [1], [0, 0, 1, 1], [], []>} : vector<16x72xf32>, vector<72x256xf32>, vector<16x256xf32> -> vector<16x256xf32>
    %39 = vector.broadcast %4 : vector<16x1xf32> to vector<16x256xf32>
    %40 = arith.addf %38, %39 : vector<16x256xf32>
    %41 = vector.extract_strided_slice %40 {offsets = [0, 0], sizes = [8, 256], strides = [1, 1]} : vector<16x256xf32> to vector<8x256xf32>
    %cst_8 = arith.constant 0.000000e+00 : f32
    %42 = vector.broadcast %cst_8 : f32 to vector<8x256xf32>
    %43 = arith.cmpf oge, %41, %42 : vector<8x256xf32>
    %cst_9 = arith.constant 1.000000e-01 : f32
    %44 = vector.broadcast %cst_9 : f32 to vector<8x256xf32>
    %45 = arith.mulf %44, %41 : vector<8x256xf32>
    %46 = arith.select %43, %41, %45 : vector<8x256xi1>, vector<8x256xf32>
    %47 = vector.extract_strided_slice %40 {offsets = [8, 0], sizes = [8, 256], strides = [1, 1]} : vector<16x256xf32> to vector<8x256xf32>
    %c0_10 = arith.constant 0 : index
    %c0_11 = arith.constant 0 : index
    %48 = vector.load %arg5[%c0_10, %c0_11] : memref<8x72xf32, #tpu.memory_space<vmem>>, vector<8x72xf32>
    %c0_12 = arith.constant 0 : index
    %c0_13 = arith.constant 0 : index
    %49 = vector.load %arg6[%c0_12, %c0_13] : memref<8x1xf32, #tpu.memory_space<vmem>>, vector<8x1xf32>
    %c17_i32_14 = arith.constant 17 : i32
    %50 = tpu.dynamic_rotate %46 by %c17_i32_14 dim 1 : vector<8x256xf32>, i32 -> vector<8x256xf32>
    %51 = vector.extract_strided_slice %2 {offsets = [0, 0], sizes = [1, 256], strides = [1, 1]} : vector<9x256xf32> to vector<1x256xf32>
    %52 = vector.broadcast %51 : vector<1x256xf32> to vector<8x256xf32>
    %53 = arith.mulf %50, %52 : vector<8x256xf32>
    %c16_i32_15 = arith.constant 16 : i32
    %54 = tpu.dynamic_rotate %46 by %c16_i32_15 dim 1 : vector<8x256xf32>, i32 -> vector<8x256xf32>
    %55 = vector.extract_strided_slice %2 {offsets = [1, 0], sizes = [1, 256], strides = [1, 1]} : vector<9x256xf32> to vector<1x256xf32>
    %56 = vector.broadcast %55 : vector<1x256xf32> to vector<8x256xf32>
    %57 = arith.mulf %54, %56 : vector<8x256xf32>
    %c15_i32_16 = arith.constant 15 : i32
    %58 = tpu.dynamic_rotate %46 by %c15_i32_16 dim 1 : vector<8x256xf32>, i32 -> vector<8x256xf32>
    %59 = vector.extract_strided_slice %2 {offsets = [2, 0], sizes = [1, 256], strides = [1, 1]} : vector<9x256xf32> to vector<1x256xf32>
    %60 = vector.broadcast %59 : vector<1x256xf32> to vector<8x256xf32>
    %61 = arith.mulf %58, %60 : vector<8x256xf32>
    %c1_i32_17 = arith.constant 1 : i32
    %62 = tpu.dynamic_rotate %46 by %c1_i32_17 dim 1 : vector<8x256xf32>, i32 -> vector<8x256xf32>
    %63 = vector.extract_strided_slice %2 {offsets = [3, 0], sizes = [1, 256], strides = [1, 1]} : vector<9x256xf32> to vector<1x256xf32>
    %64 = vector.broadcast %63 : vector<1x256xf32> to vector<8x256xf32>
    %65 = arith.mulf %62, %64 : vector<8x256xf32>
    %c255_i32_18 = arith.constant 255 : i32
    %66 = tpu.dynamic_rotate %46 by %c255_i32_18 dim 1 : vector<8x256xf32>, i32 -> vector<8x256xf32>
    %67 = vector.extract_strided_slice %2 {offsets = [5, 0], sizes = [1, 256], strides = [1, 1]} : vector<9x256xf32> to vector<1x256xf32>
    %68 = vector.broadcast %67 : vector<1x256xf32> to vector<8x256xf32>
    %69 = arith.mulf %66, %68 : vector<8x256xf32>
    %c241_i32_19 = arith.constant 241 : i32
    %70 = tpu.dynamic_rotate %46 by %c241_i32_19 dim 1 : vector<8x256xf32>, i32 -> vector<8x256xf32>
    %71 = vector.extract_strided_slice %2 {offsets = [6, 0], sizes = [1, 256], strides = [1, 1]} : vector<9x256xf32> to vector<1x256xf32>
    %72 = vector.broadcast %71 : vector<1x256xf32> to vector<8x256xf32>
    %73 = arith.mulf %70, %72 : vector<8x256xf32>
    %c240_i32_20 = arith.constant 240 : i32
    %74 = tpu.dynamic_rotate %46 by %c240_i32_20 dim 1 : vector<8x256xf32>, i32 -> vector<8x256xf32>
    %75 = vector.extract_strided_slice %2 {offsets = [7, 0], sizes = [1, 256], strides = [1, 1]} : vector<9x256xf32> to vector<1x256xf32>
    %76 = vector.broadcast %75 : vector<1x256xf32> to vector<8x256xf32>
    %77 = arith.mulf %74, %76 : vector<8x256xf32>
    %c239_i32_21 = arith.constant 239 : i32
    %78 = tpu.dynamic_rotate %46 by %c239_i32_21 dim 1 : vector<8x256xf32>, i32 -> vector<8x256xf32>
    %79 = vector.extract_strided_slice %2 {offsets = [8, 0], sizes = [1, 256], strides = [1, 1]} : vector<9x256xf32> to vector<1x256xf32>
    %80 = vector.broadcast %79 : vector<1x256xf32> to vector<8x256xf32>
    %81 = arith.mulf %78, %80 : vector<8x256xf32>
    %82 = tpu.concatenate %53, %57, %61, %65, %46, %69, %73, %77, %81 in 0 : vector<8x256xf32>, vector<8x256xf32>, vector<8x256xf32>, vector<8x256xf32>, vector<8x256xf32>, vector<8x256xf32>, vector<8x256xf32>, vector<8x256xf32>, vector<8x256xf32> -> vector<72x256xf32>
    %cst_22 = arith.constant dense<0.000000e+00> : vector<8x256xf32>
    %83 = tpu.matmul %48, %82, %cst_22 {dimension_numbers = #tpu.dot_dimension_numbers<[1], [0], [0], [1], [0, 0, 1, 1], [], []>} : vector<8x72xf32>, vector<72x256xf32>, vector<8x256xf32> -> vector<8x256xf32>
    %84 = vector.broadcast %49 : vector<8x1xf32> to vector<8x256xf32>
    %85 = arith.addf %83, %84 : vector<8x256xf32>
    %cst_23 = arith.constant 0.000000e+00 : f32
    %86 = vector.broadcast %cst_23 : f32 to vector<8x256xf32>
    %87 = arith.cmpf oge, %85, %86 : vector<8x256xf32>
    %cst_24 = arith.constant 1.000000e-01 : f32
    %88 = vector.broadcast %cst_24 : f32 to vector<8x256xf32>
    %89 = arith.mulf %88, %85 : vector<8x256xf32>
    %90 = arith.select %87, %85, %89 : vector<8x256xi1>, vector<8x256xf32>
    %91 = arith.addf %90, %47 : vector<8x256xf32>
    %c255_i32_25 = arith.constant 255 : i32
    %92 = tpu.dynamic_rotate %91 by %c255_i32_25 dim 1 : vector<8x256xf32>, i32 -> vector<8x256xf32>
    %93 = arith.maximumf %91, %92 : vector<8x256xf32>
    %c240_i32_26 = arith.constant 240 : i32
    %94 = tpu.dynamic_rotate %93 by %c240_i32_26 dim 1 : vector<8x256xf32>, i32 -> vector<8x256xf32>
    %95 = arith.maximumf %93, %94 : vector<8x256xf32>
    %c0_27 = arith.constant 0 : index
    %c0_28 = arith.constant 0 : index
    %c0_29 = arith.constant 0 : index
    %96 = vector.load %arg7[%c0_27, %c0_28, %c0_29] : memref<1x8x256xf32, #tpu.memory_space<vmem>>, vector<1x8x256xf32>
    %97 = vector.shape_cast %96 : vector<1x8x256xf32> to vector<8x256xf32>
    %98 = vector.shape_cast %95 : vector<8x256xf32> to vector<1x8x256xf32>
    tpu.vector_store %arg7[%c0_27, %c0_28, %c0_29], %98 {strides = array<i32>} : memref<1x8x256xf32, #tpu.memory_space<vmem>>, vector<1x8x256xf32>,
    return
  }
  func.func @transform_0(%arg0: i32) -> (i32, i32, i32) {
    %c0_i32 = arith.constant 0 : i32
    %c0_i32_0 = arith.constant 0 : i32
    %c0_i32_1 = arith.constant 0 : i32
    return %arg0, %c0_i32, %c0_i32_0 : i32, i32, i32
  }
  func.func @transform_1(%arg0: i32) -> (i32, i32) {
    %c0_i32 = arith.constant 0 : i32
    %c0_i32_0 = arith.constant 0 : i32
    %c0_i32_1 = arith.constant 0 : i32
    return %c0_i32, %c0_i32_0 : i32, i32
  }
  func.func @transform_2(%arg0: i32) -> (i32, i32) {
    %c0_i32 = arith.constant 0 : i32
    %c0_i32_0 = arith.constant 0 : i32
    %c0_i32_1 = arith.constant 0 : i32
    return %c0_i32, %c0_i32_0 : i32, i32
  }
  func.func @transform_3(%arg0: i32) -> (i32, i32) {
    %c0_i32 = arith.constant 0 : i32
    %c0_i32_0 = arith.constant 0 : i32
    %c0_i32_1 = arith.constant 0 : i32
    return %c0_i32, %c0_i32_0 : i32, i32
  }
  func.func @transform_4(%arg0: i32) -> (i32, i32) {
    %c0_i32 = arith.constant 0 : i32
    %c0_i32_0 = arith.constant 0 : i32
    %c0_i32_1 = arith.constant 0 : i32
    return %c0_i32, %c0_i32_0 : i32, i32
  }
  func.func @transform_5(%arg0: i32) -> (i32, i32) {
    %c0_i32 = arith.constant 0 : i32
    %c0_i32_0 = arith.constant 0 : i32
    %c0_i32_1 = arith.constant 0 : i32
    return %c0_i32, %c0_i32_0 : i32, i32
  }
  func.func @transform_6(%arg0: i32) -> (i32, i32, i32) {
    %c0_i32 = arith.constant 0 : i32
    %c0_i32_0 = arith.constant 0 : i32
    %c0_i32_1 = arith.constant 0 : i32
    return %arg0, %c0_i32, %c0_i32_0 : i32, i32, i32
  }
}

</mosaic_0001>

<bundles_post_ra>
// kernel: tpu_custom_call.1
= control target key start
LH: loop header
LB: loop body
LE: loop exit
PB: predicated region body
PF: predicated region fallthrough
CT: control target
= control target key end

     0   :  { %11 = vsyncpa [#allocation3], 0  ;;  %s1580_s0 = inlined_call_operand.hbm [shape: f32[2,8,256], index: 0, kind: input, shape index: {}]   ;;  %s1581_s1 = inlined_call_operand.hbm [shape: f32[9,256], index: 1, kind: input, shape index: {}]   ;;  %s1582_s2 = inlined_call_operand.vmem [shape: f32[16,72], index: 2, kind: input, shape index: {}]   ;;  %s1583_s3 = inlined_call_operand.vmem [shape: f32[16,1], index: 3, kind: input, shape index: {}]   ;;  %s1584_s4 = inlined_call_operand.vmem [shape: f32[8,72], index: 4, kind: input, shape index: {}]   ;;  %s1585_s5 = inlined_call_operand.vmem [shape: f32[8,1], index: 5, kind: input, shape index: {}]   ;;  %s1586_s6 = inlined_call_operand.hbm [shape: f32[2,8,256], index: 6, kind: output, shape index: {}]  }
   0x1   :  { %13 = vsyncpa [#allocation3 + $0x1], 0 }
   0x2   :  { %14 = vsyncpa [#allocation6], 0 }
   0x3   :  { %15 = vsyncpa [#allocation4], 0 }
   0x4   :  { %17 = vsyncpa [#allocation4 + $0x1], 0  ;;  %s1103_s21 = smov 0   ;;  %s1105_s22 = smov 0  }
   0x5   :  { %s1107_s23 = smov 0   ;;  %s1109_s24 = smov 0  }
   0x6 LB: > { %s1124_s25 = sadd.s32 4294967295, %s1051_s24   ;;  %s797_s26 = sadd.s32 4294967294, %s1051_s24   ;;  %s1051_s24 = sphi %s1109_s24, %s1606_s24   ;;  %s1047_s23 = sphi %s1107_s23, %s1605_s23   ;;  %s1043_s22 = sphi %s1105_s22, %s1604_s22   ;;  %s1039_s21 = sphi %s1103_s21, %s1603_s21  }
   0x7   : > { %p43_p0 = scmp.ne.s32.totalorder %s1043_s22, %s1039_s21  ;;  %p1587_p1 = scmp.eq.s32.totalorder %s1124_s25, 0 }
   0x8   : > { %p178_p3 = scmp.eq.s32.totalorder %s797_s26, 1  ;;  %p798_p5 = scmp.ge.s32.totalorder %s1051_s24, 1 }
   0x9   : > { %p1133_p4 = por %p1587_p1, %p43_p0  ;;  %p185_p7 = scmp.lt.s32.totalorder %s1051_s24, 3 }
   0xa   : > { %p1138_p6 = por %p178_p3, %p43_p0  ;;  %s1053_s30 = smov [#allocation5]  }
   0xb   : > { %s1590_s27 = scalar_select %p1133_p4, 1, 0 }
   0xc   : > { %s1591_s28 = scalar_select %p1138_p6, 1, 0 }
   0xd   : > { %p1143_p8 = pnand %p798_p5, %p185_p7  ;;  %s197_s7 = sshll.u32 %s1053_s30, 4  ;;  %s1147_s7 = int_to_ptr.vmem [resolvable:$true] %s197_s7 }
   0xe   : > { %s1159_s9 = sadd.s32 1, %s1051_s24   ;;  %s30_s10 = sadd.s32 1, %s1047_s23 }
   0xf   : > { %s1592_s29 = scalar_select %p1143_p8, 1, 0 }
  0x10   : > { %p860_p9 = pneg %p1143_p8  ;;  %s27_s11 = ssub.s32 %s1051_s24, %s1159_s9 }
  0x11   : > { %s923_s14 = scalar_lea.hbm %s1581_s1, 512 }
  0x12   : > { %p1154_p11 = pnand %p860_p9, %p1587_p1  ;;  %p924_p12 = scmp.ne.s32.totalorder %s1581_s1, %s923_s14 }
  0x13   : > { %p930_p5 = scmp.lt.u32.totalorder %s923_s14, %s1581_s1 }
  0x14   : > { %p925_p13 = pneg %p1154_p11 }
  0x16   : > { %p926_p0 = pnand %p925_p13, %p924_p12 }
  0x18   : > { %p927_p3 = pneg %p926_p0 }
  0x1a   : > { %p932_p7 = pnand %p930_p5, %p927_p3 }
  0x1c   : > { %935 = shalt.err (!%p932_p7)
}
  0x1d   : > { %s936_s19 = scalar_lea.vmem %s1147_s7, 512  ;;  %p944_p2 = scmp.lt.s32.totalorder %s1147_s7, %s1147_s7 }
  0x1e   : > { %p937_p9 = scmp.ne.s32.totalorder %s1147_s7, %s936_s19  ;;  %p945_p6 = scmp.lt.s32.totalorder %s936_s19, %s936_s19 }
  0x20   : > { %p939_p10 = pnand %p937_p9, %p925_p13  ;;  %p946_p4 = por %p945_p6, %p944_p2 }
  0x22   : > { %p940_p1 = pneg %p939_p10 }
  0x24   : > { %p947_p8 = pnand %p946_p4, %p940_p1 }
  0x26   : > { %950 = shalt.err (!%p947_p8)
}
  0x27   : > { %s1054_s20 = smov 256   ;;  %s1055_s26 = smov 16  }
  0x28   : > { %863 = dma.hbm_to_vmem [thread:$0]  (!%p1154_p11), %s1581_s1, 512, %s1147_s7, [#allocation6], %s1054_s20, %s1054_s20, %s1055_s26  }
  0x29   : > { %p28_p2 = scmp.eq.s32.totalorder %s27_s11, 0  ;;  %p37_p1 = scmp.ne.s32.totalorder %s1047_s23, %s1043_s22 }
  0x2a   : > { %p38_p4 = scmp.eq.s32.totalorder %s1051_s24, 0  ;;  %p873_p6 = scmp.lt.s32.totalorder %s1051_s24, 2 }
  0x2b   : > { %s1190_s13 = scalar_select %p28_p2, %s1047_s23, %s30_s10  }
  0x2c   : > { %p39_p8 = por %p38_p4, %p37_p1  ;;  %p1594_p10 = scmp.eq.s32.totalorder %s1124_s25, 1 }
  0x2d   : > { %s223_s15 = sand.u32 1, %s1047_s23   ;;  %s818_s16 = sshll.u32 %s1051_s24, 8 }
  0x2e   : > { %p1194_p12 = por %p1594_p10, %p37_p1  ;;  %s801_s17 = sshll.u32 %s223_s15, 4 }
  0x2f   : > { %s1203_s19 = scalar_lea.hbm %s1580_s0, %s818_s16  ;;  %s227_s7 = scalar_lea.vmem [#allocation2], %s801_s17 }
  0x30   : > { %s235_s10 = sshll.u32 %s227_s7, 4  ;;  %p1205_p11 = pnand %p873_p6, %p39_p8  ;;  %s1209_s10 = int_to_ptr.vmem [resolvable:$true] %s235_s10 }
  0x31   : > { %s224_s20 = scalar_lea.sflag [#allocation3], %s223_s15  ;;  %s951_s26 = scalar_lea.hbm %s1203_s19, 256 }
  0x32   : > { %p952_p13 = scmp.ne.s32.totalorder %s1203_s19, %s951_s26  ;;  %p953_p0 = pneg %p1205_p11 }
  0x33   : > { %s956_s16 = scalar_lea.hbm %s1580_s0, 512  ;;  %p957_p7 = scmp.lt.u32.totalorder %s1203_s19, %s1580_s0 }
  0x34   : > { %p954_p3 = pnand %p953_p0, %p952_p13  ;;  %p958_p9 = scmp.lt.u32.totalorder %s956_s16, %s951_s26 }
  0x35   : > { %p960_p1 = scmp.lt.u32.totalorder %s951_s26, %s1203_s19 }
  0x36   : > { %p955_p5 = pneg %p954_p3  ;;  %p959_p2 = por %p958_p9, %p957_p7 }
  0x38   : > { %p961_p4 = por %p960_p1, %p959_p2 }
  0x3a   : > { %p962_p6 = pnand %p961_p4, %p955_p5 }
  0x3c   : > { %965 = shalt.err (!%p962_p6)
}
  0x3d   : > { %s966_s15 = scalar_lea.vmem %s1209_s10, 256  ;;  %s1056_s18 = smov [#allocation2]  }
  0x3e   : > { %p967_p8 = scmp.ne.s32.totalorder %s1209_s10, %s966_s15  ;;  %s971_s7 = sshll.u32 %s1056_s18, 4  ;;  %s972_s7 = int_to_ptr.vmem [resolvable:$false] %s971_s7 }
  0x3f   : > { %s973_s30 = scalar_lea.vmem %s972_s7, 512  ;;  %p974_p3 = scmp.lt.s32.totalorder %s1209_s10, %s972_s7 }
  0x40   : > { %p969_p10 = pnand %p967_p8, %p953_p0  ;;  %p975_p7 = scmp.lt.s32.totalorder %s973_s30, %s966_s15 }
  0x42   : > { %p970_p13 = pneg %p969_p10  ;;  %p976_p9 = por %p975_p7, %p974_p3 }
  0x44   : > { %p977_p2 = pnand %p976_p9, %p970_p13 }
  0x46   : > { %980 = shalt.err (!%p977_p2)
}
  0x47   : > { %867 = dma.hbm_to_vmem [thread:$0]  (!%p1205_p11), %s1203_s19, 256, %s1209_s10, %s224_s20  }
  0x48   : > { %p1597_p5 = scmp.ne.s32.totalorder %s1592_s29, 0 }
  0x49   : > { %s1239_s26 = sand.u32 (!%p1597_p5), 1, %s1043_s22   ;;  %p1598_p0 = scmp.ne.s32.totalorder (!%p1597_p5), %s1590_s27, 0 }
  0x4a   : > { %244 = sbr.rel (%p1597_p5) target bundleno = 1077 (0x435), region = 44  ;;  %s805_s12 = sshll.u32 (!%p1597_p5), %s1239_s26, 4 }
  0x4b   : > { %s247_s16 = scalar_lea.sflag (!%p1597_p5), [#allocation3], %s1239_s26  ;;  %s250_s17 = scalar_lea.vmem (!%p1597_p5), [#allocation2], %s805_s12 }
  0x51   : > { %1026 = dma.done.wait (%p1598_p0), %s247_s16, 256  }
  0x52   : > { %1028 = vsyncadd (%p1598_p0), %s247_s16, 4294967040  ;;  %p1599_p11 = scmp.eq.s32.totalorder %s1124_s25, 0 }
  0x54   : > { %1030 = dma.done.wait (%p1599_p11), [#allocation6], 512   ;;  %p1600_p1 = pmov %p1599_p11 }
  0x55   : > { %v1253_v0 = vld [vmem:[%s250_s17] sm:$0xff]  ;;  %s1057_s29 = smov 16   ;;  %s1058_s19 = smov 17   ;;  %v1259_v1 = vld [vmem:[%s250_s17 + $0x8] sm:$0xff]  ;;  %v1063_v2 = vmov 0.0   ;;  %v1064_v3 = vmov 0   ;;  %v297_v5 = vlaneseq }
  0x56   : > { %1032 = vsyncadd (%p1600_p1), [#allocation6], 4294966784  ;;  %312 = vrot.lane.b32.xlu1 %v1253_v0, %s1057_s29  ;;  %293 = vrot.lane.b32.xlu0 %v1253_v0, %s1058_s19  ;;  %s1059_s27 = smov 15   ;;  %s1060_s10 = smov 1   ;;  %v291_v4 = vld [vmem:[%s1583_s3] sm:$0xff]  ;;  %v1302_v11 = vld [vmem:[#allocation5 + $0x8] sm:$0xff] }
  0x57   : > { %s1061_s11 = smov 127   ;;  %s1062_s20 = smov 113   ;;  %512 = vmatprep.mubr.f32.mxu0 %v1063_v2  ;;  %669 = vmatprep.mubr.f32.mxu1 %v1063_v2  ;;  %v1294_v6 = vshrl.u32 %v297_v5, 7  ;;  %v1296_v7 = vand.u32 127, %v297_v5  ;;  %v1300_v10 = vld [vmem:[#allocation5] sm:$0xff]  ;;  %vm441_vm8 = vcmask 588800  }
  0x58   : > { %921 = vset.pattern.permute.xlu0 %v1064_v3  ;;  %922 = vset.pattern.permute.xlu1 %v1064_v3  ;;  %s1065_s8 = smov 112   ;;  %s1066_s15 = smov 111  }
  0x59   : > { %v321_v8 = vsub.s32 1, %v1294_v6  ;;  %v304_v9 = vsub.s32 0, %v1294_v6  ;;  %vm316_vm0 = vcmp.lt.s32.totalorder %v1296_v7, 16  ;;  %vm299_vm1 = vcmp.lt.s32.totalorder %v1296_v7, 17  ;;  %s819_s7 = sshll.u32 %s1124_s25, 8  ;;  %s282_s30 = scalar_lea.vmem [#allocation7], %s805_s12 }
  0x5a   : > { %314 = vrot.lane.b32.xlu1 %v1259_v1, %s1057_s29  ;;  %295 = vrot.lane.b32.xlu0 %v1259_v1, %s1058_s19  ;;  %v338_v20 = vsub.s32 2, %v1294_v6  ;;  %v355_v21 = vsub.s32 3, %v1294_v6  ;;  %vm333_vm2 = vcmp.lt.s32.totalorder %v1296_v7, 15  ;;  %vm350_vm3 = vcmp.lt.s32.totalorder %v1296_v7, 1  ;;  %s703_s25 = scalar_lea.sflag [#allocation4], %s1239_s26 }
  0x5b   : > { %v1307_v14 = vrot.slane %v1300_v10, %v321_v8  ;;  %v1310_v15 = vrot.slane %v1300_v10, %v304_v9  ;;  %v1313_v16 = vrot.slane %v1302_v11, %v304_v9  ;;  %v1316_v17 = vrot.slane %v1302_v11, %v321_v8 }
  0x5c   : > { %v372_v34 = vsub.s32 5, %v1294_v6  ;;  %v1336_v35 = vrot.slane %v1300_v10, %v338_v20  ;;  %v1339_v36 = vrot.slane %v1302_v11, %v338_v20  ;;  %v1342_v37 = vrot.slane %v1300_v10, %v355_v21 }
  0x5d   : > { %v1345_v38 = vrot.slane %v1302_v11, %v355_v21  ;;  %vm367_vm4 = vcmp.lt.s32.totalorder %v1296_v7, 127  ;;  %v389_v57 = vsub.s32 6, %v1294_v6  ;;  %v406_v60 = vsub.s32 7, %v1294_v6  ;;  %v1403_v21 = vld [vmem:[#allocation5 + $0x18] ss:$0 sm:$0xff] }
  0x5e   : > { %331 = vrot.lane.b32.xlu1 %v1259_v1, %s1059_s27  ;;  %329 = vrot.lane.b32.xlu0 %v1253_v0, %s1059_s27  ;;  %v1357_v45 = vrot.slane %v1300_v10, %v372_v34  ;;  %v1360_v46 = vrot.slane %v1302_v11, %v372_v34  ;;  %vm384_vm5 = vcmp.lt.s32.totalorder %v1296_v7, 113  ;;  %vm401_vm6 = vcmp.lt.s32.totalorder %v1296_v7, 112 }
  0x5f   : > { %v1381_v5 = vrot.slane %v1302_v11, %v389_v57  ;;  %v1385_v6 = vrot.slane %v1300_v10, %v406_v60  ;;  %v1388_v8 = vrot.slane %v1302_v11, %v406_v60  ;;  %vm418_vm7 = vcmp.lt.s32.totalorder %v1296_v7, 111 }
  0x62   : > { %348 = vrot.lane.b32.xlu1 %v1259_v1, %s1060_s10  ;;  %346 = vrot.lane.b32.xlu0 %v1253_v0, %s1060_s10 }
  0x66   : > { %365 = vrot.lane.b32.xlu1 %v1259_v1, %s1061_s11  ;;  %363 = vrot.lane.b32.xlu0 %v1253_v0, %s1061_s11 }
  0x6a   : > { %382 = vrot.lane.b32.xlu1 %v1259_v1, %s1062_s20  ;;  %380 = vrot.lane.b32.xlu0 %v1253_v0, %s1062_s20 }
  0x6e   : > { %399 = vrot.lane.b32.xlu1 %v1259_v1, %s1065_s8  ;;  %397 = vrot.lane.b32.xlu0 %v1253_v0, %s1065_s8 }
  0x72   : > { %416 = vrot.lane.b32.xlu1 %v1259_v1, %s1066_s15  ;;  %414 = vrot.lane.b32.xlu0 %v1253_v0, %s1066_s15 }
  0x76   : > { %433 = vperm.xlu0 %921, %v291_v4   ;;  %v1378_v4 = vrot.slane %v1300_v10, %v389_v57 }
  0xc8   : > { %v313_v12 = vpop.permute.xlu1 %312  ;;  %v294_v13 = vpop.permute.xlu0 %293 }
  0xcc   : > { %v315_v18 = vpop.permute.xlu1 %314  ;;  %v296_v19 = vpop.permute.xlu0 %295 }
  0xcd   : > { %v317_v22 = vsel %vm316_vm0, %v313_v12, %v315_v18  ;;  %v318_v23 = vsel %vm316_vm0, %v315_v18, %v313_v12  ;;  %v300_v24 = vsel %vm299_vm1, %v294_v13, %v296_v19  ;;  %v301_v25 = vsel %vm299_vm1, %v296_v19, %v294_v13 }
  0xce   : > { %v327_v26 = vmul.f32 %v1307_v14, %v318_v23  ;;  %v310_v27 = vmul.f32 %v1310_v15, %v301_v25  ;;  %v311_v28 = vmul.f32 %v1313_v16, %v300_v24  ;;  %v328_v29 = vmul.f32 %v1316_v17, %v317_v22  ;;  %v1405_v24 = vld [vmem:[#allocation5 + $0x10] ss:$0 sm:$0xff] }
  0xd0   : > { %v332_v30 = vpop.permute.xlu1 %331  ;;  %v330_v31 = vpop.permute.xlu0 %329  ;;  %v820_v32 = vpack.c.bf16 %v328_v29, %v311_v28  ;;  %v822_v33 = vpack.c.bf16 %v327_v26, %v310_v27 }
  0xd1   : > { %v334_v39 = vsel %vm333_vm2, %v330_v31, %v332_v30  ;;  %v335_v40 = vsel %vm333_vm2, %v332_v30, %v330_v31  ;;  %v289_v31 = vld [vmem:[%s1582_s2] sm:$0xff] }
  0xd2   : > { %821 = vmatprep.subr.bf16.mxu0 %v820_v32  ;;  %v344_v47 = vmul.f32 %v1336_v35, %v335_v40  ;;  %v345_v48 = vmul.f32 %v1339_v36, %v334_v39 }
  0xd3   : > { %823 = vmatpush1.bf16.msra.mxu0 %v822_v33 }
  0xd4   : > { %v349_v41 = vpop.permute.xlu1 %348  ;;  %v347_v42 = vpop.permute.xlu0 %346 }
  0xd5   : > { %v351_v43 = vsel %vm350_vm3, %v347_v42, %v349_v41  ;;  %v352_v44 = vsel %vm350_vm3, %v349_v41, %v347_v42 }
  0xd6   : > { %v361_v49 = vmul.f32 %v1342_v37, %v352_v44  ;;  %v362_v50 = vmul.f32 %v1345_v38, %v351_v43 }
  0xd8   : > { %v366_v51 = vpop.permute.xlu1 %365  ;;  %v364_v52 = vpop.permute.xlu0 %363  ;;  %v824_v53 = vpack.c.bf16 %v362_v50, %v345_v48  ;;  %v826_v54 = vpack.c.bf16 %v361_v49, %v344_v47  ;;  %v290_v47 = vld [vmem:[%s1582_s2 + $0x8] sm:$0xff] }
  0xd9   : > { %v368_v55 = vsel %vm367_vm4, %v364_v52, %v366_v51  ;;  %v369_v56 = vsel %vm367_vm4, %v366_v51, %v364_v52  ;;  %v292_v48 = vld [vmem:[%s1583_s3 + $0x8] sm:$0xff] }
  0xda   : > { %v378_v58 = vmul.f32 %v1357_v45, %v368_v55  ;;  %v379_v59 = vmul.f32 %v1360_v46, %v369_v56  ;;  %825 = vmatprep.subr.bf16.mxu0 %v824_v53 }
  0xdb   : > { %827 = vmatpush1.bf16.msra.mxu0 %v826_v54 }
  0xdc   : > { %v383_v61 = vpop.permute.xlu1 %382  ;;  %v381_v62 = vpop.permute.xlu0 %380  ;;  %v828_v63 = vpack.c.bf16 %v379_v59, %v1259_v1  ;;  %v830_v3 = vpack.c.bf16 %v378_v58, %v1253_v0 }
  0xdd   : > { %v385_v1 = vsel %vm384_vm5, %v381_v62, %v383_v61  ;;  %v386_v0 = vsel %vm384_vm5, %v383_v61, %v381_v62 }
  0xde   : > { %829 = vmatprep.subr.bf16.mxu0 %v828_v63  ;;  %v395_v10 = vmul.f32 %v1378_v4, %v385_v1  ;;  %v396_v11 = vmul.f32 %v1381_v5, %v386_v0 }
  0xdf   : > { %831 = vmatpush1.bf16.msra.mxu0 %v830_v3 }
  0xe0   : > { %v400_v9 = vpop.permute.xlu1 %399  ;;  %v398_v12 = vpop.permute.xlu0 %397 }
  0xe1   : > { %v402_v13 = vsel %vm401_vm6, %v398_v12, %v400_v9  ;;  %v403_v18 = vsel %vm401_vm6, %v400_v9, %v398_v12 }
  0xe2   : > { %v412_v19 = vmul.f32 %v1385_v6, %v402_v13  ;;  %v413_v20 = vmul.f32 %v1388_v8, %v403_v18 }
  0xe4   : > { %v417_v22 = vpop.permute.xlu1 %416  ;;  %v832_v23 = vpack.c.bf16 %v413_v20, %v396_v11  ;;  %v415_v25 = vpop.permute.xlu0 %414  ;;  %v834_v26 = vpack.c.bf16 %v412_v19, %v395_v10 }
  0xe5   : > { %v419_v27 = vsel %vm418_vm7, %v415_v25, %v417_v22  ;;  %v420_v28 = vsel %vm418_vm7, %v417_v22, %v415_v25 }
  0xe6   : > { %833 = vmatprep.subr.bf16.mxu0 %v832_v23  ;;  %v430_v29 = vmul.f32 %v1403_v21, %v420_v28  ;;  %v429_v30 = vmul.f32 %v1405_v24, %v419_v27 }
  0xe7   : > { %835 = vmatpush1.bf16.msra.mxu0 %v834_v26 }
  0xe8   : > { %464 = vmatprep.subr.mxu0 %v430_v29 }
  0xeb   : > { %465 = vmatpush1.msra.mxu0 %v429_v30 }
  0xec   : > { %810 = vmatmul.mubr.msk.f32.vlgmr.msra.gmra.mrb[0].mxu0 %vm441_vm8, %v289_v31 }
  0xed   : > { %518 = vmatprep.mubr.f32.mxu0 %v1063_v2  ;;  %v532_v2 = vld [vmem:[%s1585_s5] sm:$0xff] }
  0xf0   : > { %811 = vmatmul.mubr.msk.f32.gmra.mrb[2].mxu0 %vm441_vm8, %v290_v47 }
  0xf5   : > { %v434_v32 = vpop.permute.xlu0 %433 }
 0x1bf   : > { %v514_v33 = vpop.f32.mrb[0].mxu0 }
 0x1c0   : > { %v515_v34 = vadd.f32 %v514_v33, %v434_v32  ;;  %v516_v39 = vpop.f32.mrb[1].mxu0 }
 0x1c1   : > { %v517_v40 = vadd.f32 %v516_v39, %v434_v32 }
 0x1c2   : > { %vm525_vm9 = vcmp.ge.f32.partialorder %v515_v34, 0.0  ;;  %v527_v41 = vmul.f32 0.1, %v515_v34 }
 0x1c3   : > { %v528_v43 = vmul.f32 0.1, %v517_v40  ;;  %vm526_vm10 = vcmp.ge.f32.partialorder %v517_v40, 0.0 }
 0x1c4   : > { %v1418_v42 = vsel %vm525_vm9, %v515_v34, %v527_v41 }
 0x1c5   : > { %541 = vrot.lane.b32.xlu0 %v1418_v42, %s1057_s29  ;;  %533 = vrot.lane.b32.xlu1 %v1418_v42, %s1058_s19  ;;  %v1424_v44 = vsel %vm526_vm10, %v517_v40, %v528_v43 }
 0x1c9   : > { %549 = vrot.lane.b32.xlu0 %v1418_v42, %s1059_s27  ;;  %535 = vrot.lane.b32.xlu1 %v1424_v44, %s1058_s19 }
 0x1cd   : > { %557 = vrot.lane.b32.xlu0 %v1418_v42, %s1060_s10  ;;  %543 = vrot.lane.b32.xlu1 %v1424_v44, %s1057_s29  ;;  %s1536_s29 = scalar_lea.hbm %s1586_s6, %s819_s7 }
 0x1d1   : > { %565 = vrot.lane.b32.xlu0 %v1418_v42, %s1061_s11  ;;  %551 = vrot.lane.b32.xlu1 %v1424_v44, %s1059_s27 }
 0x1d5   : > { %573 = vrot.lane.b32.xlu0 %v1418_v42, %s1062_s20  ;;  %559 = vrot.lane.b32.xlu1 %v1424_v44, %s1060_s10 }
 0x1d9   : > { %581 = vrot.lane.b32.xlu0 %v1418_v42, %s1065_s8  ;;  %567 = vrot.lane.b32.xlu1 %v1424_v44, %s1061_s11 }
 0x1dd   : > { %589 = vrot.lane.b32.xlu0 %v1418_v42, %s1066_s15  ;;  %575 = vrot.lane.b32.xlu1 %v1424_v44, %s1062_s20 }
 0x1e1   : > { %599 = vperm.xlu0 %921, %v532_v2   ;;  %583 = vrot.lane.b32.xlu1 %v1424_v44, %s1065_s8 }
 0x1e5   : > { %591 = vrot.lane.b32.xlu1 %v1424_v44, %s1066_s15 }
 0x1e9   : > { %438 = vperm.xlu1 %922, %v292_v48  }
 0x237   : > { %v542_v49 = vpop.permute.xlu0 %541  ;;  %v534_v50 = vpop.permute.xlu1 %533 }
 0x23b   : > { %v550_v51 = vpop.permute.xlu0 %549  ;;  %v536_v52 = vpop.permute.xlu1 %535 }
 0x23c   : > { %v537_v53 = vsel %vm299_vm1, %v534_v50, %v536_v52  ;;  %v538_v54 = vsel %vm299_vm1, %v536_v52, %v534_v50 }
 0x23d   : > { %v539_v59 = vmul.f32 %v538_v54, %v1310_v15  ;;  %v540_v61 = vmul.f32 %v537_v53, %v1313_v16 }
 0x23f   : > { %v558_v55 = vpop.permute.xlu0 %557  ;;  %v544_v56 = vpop.permute.xlu1 %543 }
 0x240   : > { %v545_v57 = vsel %vm316_vm0, %v542_v49, %v544_v56  ;;  %v546_v58 = vsel %vm316_vm0, %v544_v56, %v542_v49 }
 0x241   : > { %v547_v60 = vmul.f32 %v546_v58, %v1307_v14  ;;  %v548_v62 = vmul.f32 %v545_v57, %v1316_v17 }
 0x243   : > { %v552_v63 = vpop.permute.xlu1 %551  ;;  %v836_v3 = vpack.c.bf16 %v548_v62, %v540_v61  ;;  %v838_v1 = vpack.c.bf16 %v547_v60, %v539_v59  ;;  %v566_v0 = vpop.permute.xlu0 %565 }
 0x244   : > { %v553_v9 = vsel %vm333_vm2, %v550_v51, %v552_v63  ;;  %v554_v12 = vsel %vm333_vm2, %v552_v63, %v550_v51 }
 0x245   : > { %837 = vmatprep.subr.bf16.mxu1 %v836_v3  ;;  %v555_v16 = vmul.f32 %v554_v12, %v1336_v35  ;;  %v556_v17 = vmul.f32 %v553_v9, %v1339_v36 }
 0x246   : > { %839 = vmatpush1.bf16.msra.mxu1 %v838_v1 }
 0x247   : > { %v560_v13 = vpop.permute.xlu1 %559  ;;  %v574_v11 = vpop.permute.xlu0 %573 }
 0x248   : > { %v561_v14 = vsel %vm350_vm3, %v558_v55, %v560_v13  ;;  %v562_v15 = vsel %vm350_vm3, %v560_v13, %v558_v55 }
 0x249   : > { %v563_v18 = vmul.f32 %v562_v15, %v1342_v37  ;;  %v564_v10 = vmul.f32 %v561_v14, %v1345_v38 }
 0x24b   : > { %v568_v19 = vpop.permute.xlu1 %567  ;;  %v840_v20 = vpack.c.bf16 %v564_v10, %v556_v17  ;;  %v842_v22 = vpack.c.bf16 %v563_v18, %v555_v16  ;;  %v582_v27 = vpop.permute.xlu0 %581 }
 0x24c   : > { %v569_v23 = vsel %vm367_vm4, %v566_v0, %v568_v19  ;;  %v570_v25 = vsel %vm367_vm4, %v568_v19, %v566_v0 }
 0x24d   : > { %v571_v26 = vmul.f32 %v569_v23, %v1357_v45  ;;  %v572_v35 = vmul.f32 %v570_v25, %v1360_v46  ;;  %841 = vmatprep.subr.bf16.mxu1 %v840_v20 }
 0x24e   : > { %843 = vmatpush1.bf16.msra.mxu1 %v842_v22 }
 0x24f   : > { %v576_v36 = vpop.permute.xlu1 %575  ;;  %v844_v37 = vpack.c.bf16 %v572_v35, %v1424_v44  ;;  %v846_v38 = vpack.c.bf16 %v571_v26, %v1418_v42  ;;  %v590_v39 = vpop.permute.xlu0 %589 }
 0x250   : > { %v577_v28 = vsel %vm384_vm5, %v574_v11, %v576_v36  ;;  %v578_v29 = vsel %vm384_vm5, %v576_v36, %v574_v11 }
 0x251   : > { %845 = vmatprep.subr.bf16.mxu1 %v844_v37  ;;  %v579_v31 = vmul.f32 %v577_v28, %v1378_v4  ;;  %v580_v32 = vmul.f32 %v578_v29, %v1381_v5  ;;  %v531_v5 = vld [vmem:[%s1584_s4] sm:$0xff] }
 0x252   : > { %847 = vmatpush1.bf16.msra.mxu1 %v846_v38 }
 0x253   : > { %v584_v30 = vpop.permute.xlu1 %583 }
 0x254   : > { %v585_v45 = vsel %vm401_vm6, %v582_v27, %v584_v30  ;;  %v586_v46 = vsel %vm401_vm6, %v584_v30, %v582_v27 }
 0x255   : > { %v587_v33 = vmul.f32 %v585_v45, %v1385_v6  ;;  %v588_v34 = vmul.f32 %v586_v46, %v1388_v8  ;;  %v520_v6 = vpop.f32.mrb[2].mxu0 }
 0x256   : > { %v522_v8 = vpop.f32.mrb[3].mxu0 }
 0x257   : > { %v592_v40 = vpop.permute.xlu1 %591  ;;  %v848_v41 = vpack.c.bf16 %v588_v34, %v580_v32  ;;  %v850_v42 = vpack.c.bf16 %v587_v33, %v579_v31 }
 0x258   : > { %v594_v43 = vsel %vm418_vm7, %v592_v40, %v590_v39  ;;  %v593_v44 = vsel %vm418_vm7, %v590_v39, %v592_v40 }
 0x259   : > { %v596_v2 = vmul.f32 %v1403_v21, %v594_v43  ;;  %849 = vmatprep.subr.bf16.mxu1 %v848_v41  ;;  %v595_v4 = vmul.f32 %v1405_v24, %v593_v44 }
 0x25a   : > { %851 = vmatpush1.bf16.msra.mxu1 %v850_v42 }
 0x25b   : > { %621 = vmatprep.subr.mxu1 %v596_v2 }
 0x25e   : > { %622 = vmatpush1.msra.mxu1 %v595_v4 }
 0x25f   : > { %812 = vmatmul.mubr.msk.f32.vlgmr.msra.gmra.mrb[0].mxu1 %vm441_vm8, %v531_v5 }
 0x260   : > { %v600_v48 = vpop.permute.xlu0 %599 }
 0x268   : > { %v439_v47 = vpop.permute.xlu1 %438 }
 0x269   : > { %v521_v52 = vadd.f32 %v520_v6, %v439_v47  ;;  %v523_v54 = vadd.f32 %v522_v8, %v439_v47 }
 0x332   : > { %v671_v49 = vpop.f32.mrb[0].mxu1 }
 0x333   : > { %v672_v50 = vadd.f32 %v671_v49, %v600_v48  ;;  %v673_v51 = vpop.f32.mrb[1].mxu1 }
 0x334   : > { %v674_v21 = vadd.f32 %v673_v51, %v600_v48 }
 0x335   : > { %vm676_vm11 = vcmp.ge.f32.partialorder %v672_v50, 0.0  ;;  %v678_v53 = vmul.f32 0.1, %v672_v50 }
 0x336   : > { %vm677_vm12 = vcmp.ge.f32.partialorder %v674_v21, 0.0  ;;  %v679_v24 = vmul.f32 0.1, %v674_v21 }
 0x337   : > { %v680_v55 = vsel %vm676_vm11, %v672_v50, %v678_v53 }
 0x338   : > { %v681_v56 = vsel %vm677_vm12, %v674_v21, %v679_v24  ;;  %v682_v57 = vadd.f32 %v680_v55, %v521_v52 }
 0x339   : > { %v683_v58 = vadd.f32 %v681_v56, %v523_v54 }
 0x33a   : > { %684 = vrot.lane.b32.xlu0 %v682_v57, %s1061_s11 }
 0x33b   : > { %686 = vrot.lane.b32.xlu1 %v683_v58, %s1061_s11  ;;  %s717_s11 = sshll.u32 %s282_s30, 4  ;;  %s1538_s11 = int_to_ptr.vmem [resolvable:$true] %s717_s11 }
 0x33c   : > { %s981_s12 = scalar_lea.vmem %s1538_s11, 256 }
 0x33d   : > { %p982_p4 = scmp.ne.s32.totalorder %s1538_s11, %s981_s12 }
 0x33f   : > { %p983_p6 = pnand %p982_p4, %p1194_p12 }
 0x341   : > { %p984_p8 = pneg %p983_p6 }
 0x3ac   : > { %v685_v59 = vpop.permute.xlu0 %684 }
 0x3ad   : > { %v687_v60 = vpop.permute.xlu1 %686 }
 0x3ae   : > { %v688_v61 = vsel %vm367_vm4, %v685_v59, %v687_v60  ;;  %v689_v62 = vsel %vm367_vm4, %v687_v60, %v685_v59 }
 0x3af   : > { %v690_v63 = vmax.f32 %v682_v57, %v688_v61  ;;  %v691_v3 = vmax.f32 %v683_v58, %v689_v62 }
 0x3b1   : > { %694 = vrot.lane.b32.xlu1 %v691_v3, %s1065_s8  ;;  %692 = vrot.lane.b32.xlu0 %v690_v63, %s1065_s8  ;;  %s1067_s8 = smov [#allocation7]  }
 0x3b2   : > { %s985_s19 = sshll.u32 %s1067_s8, 4  ;;  %s986_s19 = int_to_ptr.vmem [resolvable:$false] %s985_s19 }
 0x3b3   : > { %s987_s27 = scalar_lea.vmem %s986_s19, 512  ;;  %p988_p10 = scmp.lt.s32.totalorder %s1538_s11, %s986_s19 }
 0x3b4   : > { %p989_p13 = scmp.lt.s32.totalorder %s987_s27, %s981_s12 }
 0x3b6   : > { %p990_p3 = por %p989_p13, %p988_p10 }
 0x3b8   : > { %p991_p7 = pnand %p990_p3, %p984_p8 }
 0x423   : > { %v695_v1 = vpop.permute.xlu1 %694  ;;  %v693_v0 = vpop.permute.xlu0 %692 }
 0x424   : > { %v696_v9 = vsel %vm401_vm6, %v693_v0, %v695_v1  ;;  %v697_v12 = vsel %vm401_vm6, %v695_v1, %v693_v0 }
 0x425   : > { %v698_v13 = vmax.f32 %v690_v63, %v696_v9  ;;  %v699_v14 = vmax.f32 %v691_v3, %v697_v12 }
 0x427   : > { %700 = vst [vmem:[%s282_s30] sm:$0xff] %v698_v13  ;;  %701 = vst [vmem:[%s282_s30 + $0x8] sm:$0xff] %v699_v14 }
 0x428   : > { %994 = shalt.err (!%p991_p7)
}
 0x429   : > { %s995_s26 = scalar_lea.hbm %s1536_s29, 256  ;;  %s999_s20 = scalar_lea.hbm %s1586_s6, 512 }
 0x42a   : > { %p996_p9 = scmp.ne.s32.totalorder %s1536_s29, %s995_s26  ;;  %p1000_p0 = scmp.lt.u32.totalorder %s1536_s29, %s1586_s6 }
 0x42b   : > { %p1001_p11 = scmp.lt.u32.totalorder %s999_s20, %s995_s26  ;;  %p1003_p4 = scmp.lt.u32.totalorder %s995_s26, %s1536_s29 }
 0x42c   : > { %p997_p2 = pnand %p996_p9, %p1194_p12 }
 0x42d   : > { %p1002_p1 = por %p1001_p11, %p1000_p0 }
 0x42e   : > { %p998_p5 = pneg %p997_p2 }
 0x42f   : > { %p1004_p6 = por %p1003_p4, %p1002_p1 }
 0x431   : > { %p1005_p8 = pnand %p1004_p6, %p998_p5 }
 0x433   : > { %1008 = shalt.err (!%p1005_p8)
}
 0x434   : > { %858 = dma.vmem_to_hbm [thread:$0]  (%p1194_p12), %s1538_s11, 256, %s1536_s29, %s703_s25  }
 0x435 PF: > { %s729_s30 = sand.u32 1, %s1039_s21   ;;  %p1601_p10 = scmp.ne.s32.totalorder %s1591_s28, 0 }
 0x436   : > { %p1602_p13 = scmp.ge.s32.totalorder %s1051_s24, 2  ;;  %s730_s16 = scalar_lea.sflag [#allocation4], %s729_s30 }
 0x438   : > { %p869_p3 = pnand %p1602_p13, %p1601_p10 }
 0x43a   : > { %1034 = dma.done.wait (!%p869_p3), %s730_s16, 256  }
 0x43b   : > { %1036 = vsyncadd (!%p869_p3), %s730_s16, 4294967040  ;;  %p20_p7 = scmp.ge.s32.totalorder %s1159_s9, 4   ;;  %s1603_s21 = smov %s1043_s22 }
 0x43c   : > { %s1604_s22 = smov %s1047_s23  ;;  %s1605_s23 = smov %s1190_s13 }
 0x43d   : > { %s1606_s24 = smov %s1159_s9  ;;  %22 = sbr.rel (!%p20_p7) target bundleno = 6 (0x6), region = 93 }
 0x444   :  { %735 = vsyncpa [#allocation3], 1 }
 0x445   :  { %737 = vsyncpa [#allocation3 + $0x1], 1 }
 0x446   :  { %738 = vsyncpa [#allocation6], 1 }
 0x447   :  { %739 = vsyncpa [#allocation4], 1 }
 0x448   :  { %741 = vsyncpa [#allocation4 + $0x1], 1 }

</bundles_post_ra>
